<compile_context>
chip_gen: v7x
topology: tpu7x:2x2x1
jax: 0.10.0
libtpu: 0.0.40
codegen_flags: <defaults>
</compile_context>

<pallas_src>
import functools

import jax
import jax.numpy as jnp
from jax.experimental import pallas as pl
from jax.experimental.pallas import tpu as pltpu

BN_EPS = 1e-5
_LANES = 128
_ROW_TILE_CAP = 2048  # rows per block (~1 MiB/operand) -> fits v5e/v6e/v7x VMEM


# ----------------------------------------------------------------------------
# helpers
# ----------------------------------------------------------------------------
def _round_up(v, m):
    return ((v + m - 1) // m) * m


def _row_tiling(rows):
    tile = min(_ROW_TILE_CAP, _round_up(rows, 8))
    return tile, _round_up(rows, tile)


def _pad_rows(a, rows_p):
    pad = rows_p - a.shape[1]
    if pad == 0:
        return a
    return jnp.pad(a, ((0, 0), (0, pad), (0, 0)))


def _cparams(*semantics):
    return pltpu.CompilerParams(
        dimension_semantics=semantics,
        vmem_limit_bytes=32 * 1024 * 1024,
    )


def _bn_affine(s1, s2, count, gamma, beta, eps=BN_EPS):
    """Fold BatchNorm (training-mode batch stats) into one scale/shift FMA."""
    mean = s1 / count
    var = jnp.maximum(s2 / count - mean * mean, 0.0)
    scale = gamma * jax.lax.rsqrt(var + eps)
    shift = beta - mean * scale
    return scale, shift


# TODO(synk): 2x2 maxpool is a trivial reshape+max done in the wrapper.
def _maxpool2(x):  # (N, C, H, W) -> (N, C, H//2, W//2)
    n, c, h, w = x.shape
    return x.reshape(n, c, h // 2, 2, w // 2, 2).max(axis=(3, 5))


# TODO(synk): bilinear align_corners resize of the tiny 1-channel maps is done
# as jnp gather/lerp glue; it could be fused into the affine pass-B kernels.
def _bilinear_align_corners(x, out_hw):  # x: (N, H, W)
    n, h, w = x.shape
    oh, ow = out_hw

    def grid(in_s, out_s):
        if out_s == 1:
            src = jnp.zeros((1,), jnp.float32)
        else:
            src = jnp.arange(out_s, dtype=jnp.float32) * ((in_s - 1) / (out_s - 1))
        i0 = jnp.clip(jnp.floor(src).astype(jnp.int32), 0, in_s - 1)
        i1 = jnp.minimum(i0 + 1, in_s - 1)
        return i0, i1, src - i0.astype(jnp.float32)

    y0, y1, fy = grid(h, oh)
    x0, x1, fx = grid(w, ow)
    top, bot = x[:, y0, :], x[:, y1, :]
    v = top + (bot - top) * fy[None, :, None]
    left, right = v[:, :, x0], v[:, :, x1]
    return left + (right - left) * fx[None, None, :]


# ----------------------------------------------------------------------------
# Kernel 1: 1x1 conv (matmul) + bias + BN statistics (+ fused global avg pool)
# ----------------------------------------------------------------------------
def _dense_stats_kernel(x_ref, w_ref, b_ref, z_ref, s1_ref, s2_ref, ps_ref, *,
                        rows_valid):
    # x_ref : (1, TILE, Cinp) bf16 ; w_ref : (Cinp, Coutp) bf16 ; b_ref: (1, Coutp)
    # z_ref : (1, TILE, Coutp)     ; s1/s2 : (1, 1, Coutp) accumulators
    # ps_ref: (1, 1, Cinp) accumulator (input-channel sums for the avg-pool)
    t = pl.program_id(1)
    tile = x_ref.shape[1]

    @pl.when(t == 0)
    def _init():
        s1_ref[...] = jnp.zeros_like(s1_ref)
        s2_ref[...] = jnp.zeros_like(s2_ref)
        ps_ref[...] = jnp.zeros_like(ps_ref)

    x = x_ref[0]                                                    # (TILE, Cinp)
    z = jnp.dot(x, w_ref[...], preferred_element_type=jnp.float32) + b_ref[...]
    z_ref[0] = z.astype(z_ref.dtype)

    # Mask padded rows out of the BatchNorm statistics.
    rid = jax.lax.broadcasted_iota(jnp.int32, (tile, 1), 0) + t * tile
    rmask = (rid < rows_valid).astype(jnp.float32)                  # (TILE, 1)
    zm = z * rmask
    s1_ref[0] += jnp.sum(zm, axis=0, keepdims=True)
    s2_ref[0] += jnp.sum(zm * z, axis=0, keepdims=True)
    ps_ref[0] += jnp.sum(x.astype(jnp.float32) * rmask, axis=0, keepdims=True)


def dense_conv_bn_stats(x3d, w, bias, *, z_dtype=jnp.float32):
    """x3d: (G, R, Cinp) f32 ; w: (Cinp, Coutp) ; bias: (Coutp,).

    Returns z (G, R, Coutp), per-channel sum / sumsq (1, Coutp) and per-image
    input-channel sums (G, Cinp).
    """
    g, r, cinp = x3d.shape
    coutp = w.shape[1]
    tile, rows_p = _row_tiling(r)
    t_steps = rows_p // tile
    xp = _pad_rows(x3d, rows_p).astype(jnp.bfloat16)
    kernel = functools.partial(_dense_stats_kernel, rows_valid=r)

    z, s1, s2, ps = pl.pallas_call(
        kernel,
        grid=(g, t_steps),
        in_specs=[
            pl.BlockSpec((1, tile, cinp), lambda i, t: (i, t, 0)),
            pl.BlockSpec((cinp, coutp), lambda i, t: (0, 0)),
            pl.BlockSpec((1, coutp), lambda i, t: (0, 0)),
        ],
        out_specs=(
            pl.BlockSpec((1, tile, coutp), lambda i, t: (i, t, 0)),
            pl.BlockSpec((1, 1, coutp), lambda i, t: (i, 0, 0)),
            pl.BlockSpec((1, 1, coutp), lambda i, t: (i, 0, 0)),
            pl.BlockSpec((1, 1, cinp), lambda i, t: (i, 0, 0)),
        ),
        out_shape=(
            jax.ShapeDtypeStruct((g, rows_p, coutp), z_dtype),
            jax.ShapeDtypeStruct((g, 1, coutp), jnp.float32),
            jax.ShapeDtypeStruct((g, 1, coutp), jnp.float32),
            jax.ShapeDtypeStruct((g, 1, cinp), jnp.float32),
        ),
        compiler_params=_cparams("parallel", "arbitrary"),
    )(xp, w.astype(jnp.bfloat16), bias.reshape(1, coutp).astype(jnp.float32))

    if rows_p != r:
        z = z[:, :r]
    return z, jnp.sum(s1, axis=0), jnp.sum(s2, axis=0), ps[:, 0, :]


# ----------------------------------------------------------------------------
# Kernel 2: KxK spatial conv with a single output channel + BN statistics
# ----------------------------------------------------------------------------
def _spatial_conv_kernel(x_ref, wb_ref, z_ref, s1_ref, s2_ref, *, cin, ksize):
    # x_ref : (1, Cin, H+K-1, W+K-1) f32 (one zero-padded image, W on lanes)
    # wb_ref: (Cin*K*K + 1,) f32 in SMEM  (weights then bias)
    # z_ref : (1, H, W) ; s1/s2: (1, 1, 1) per-image sum / sum-of-squares
    hout, wout = z_ref.shape[1], z_ref.shape[2]
    acc = jnp.zeros((hout, wout), jnp.float32)
    for c in range(cin):
        plane = x_ref[0, c]                                 # (Hp, Wp)
        for ky in range(ksize):
            for kx in range(ksize):
                wgt = wb_ref[(c * ksize + ky) * ksize + kx]
                acc = acc + wgt * plane[ky:ky + hout, kx:kx + wout]
    acc = acc + wb_ref[cin * ksize * ksize]                 # bias
    z_ref[0] = acc
    s1_ref[0] = jnp.sum(jnp.sum(acc, axis=1, keepdims=True), axis=0,
                        keepdims=True)
    s2_ref[0] = jnp.sum(jnp.sum(acc * acc, axis=1, keepdims=True), axis=0,
                        keepdims=True)


def spatial_conv_bn_stats(x_nchw, w, bias):
    """x_nchw: (N, Cin, H, W) ; w: (Cin, K, K) ; bias: scalar. Cout == 1."""
    n, cin, h, wd = x_nchw.shape
    k = w.shape[-1]
    p = k // 2
    xp = jnp.pad(x_nchw, ((0, 0), (0, 0), (p, p), (p, p))).astype(jnp.float32)
    wb = jnp.concatenate([w.reshape(-1), jnp.reshape(bias, (1,))]
                         ).astype(jnp.float32)
    kernel = functools.partial(_spatial_conv_kernel, cin=cin, ksize=k)

    z, s1, s2 = pl.pallas_call(
        kernel,
        grid=(n,),
        in_specs=[
            pl.BlockSpec((1, cin, h + 2 * p, wd + 2 * p), lambda i: (i, 0, 0, 0)),
            pl.BlockSpec(memory_space=pltpu.MemorySpace.SMEM),
        ],
        out_specs=(
            pl.BlockSpec((1, h, wd), lambda i: (i, 0, 0)),
            pl.BlockSpec((1, 1, 1), lambda i: (i, 0, 0)),
            pl.BlockSpec((1, 1, 1), lambda i: (i, 0, 0)),
        ),
        out_shape=(
            jax.ShapeDtypeStruct((n, h, wd), jnp.float32),
            jax.ShapeDtypeStruct((n, 1, 1), jnp.float32),
            jax.ShapeDtypeStruct((n, 1, 1), jnp.float32),
        ),
        compiler_params=_cparams("parallel"),
    )(xp, wb)
    return z, jnp.sum(s1), jnp.sum(s2)


# ----------------------------------------------------------------------------
# Kernel 3: fused BN scale/shift + ReLU (+ optional residual add), 1-channel
# ----------------------------------------------------------------------------
def _affine_relu_kernel(z_ref, sb_ref, o_ref):
    o_ref[0] = jnp.maximum(z_ref[0] * sb_ref[0] + sb_ref[1], 0.0)


def _affine_relu_add_kernel(z_ref, sb_ref, a_ref, o_ref):
    o_ref[0] = jnp.maximum(z_ref[0] * sb_ref[0] + sb_ref[1], 0.0) + a_ref[0]


def affine_relu(z, scale, shift, add=None):
    """y = relu(z * scale + shift) [+ add]   on (N, H, W) maps."""
    n, h, w = z.shape
    sb = jnp.stack([scale, shift]).astype(jnp.float32)
    in_specs = [
        pl.BlockSpec((1, h, w), lambda i: (i, 0, 0)),
        pl.BlockSpec(memory_space=pltpu.MemorySpace.SMEM),
    ]
    operands = [z.astype(jnp.float32), sb]
    kernel = _affine_relu_kernel
    if add is not None:
        kernel = _affine_relu_add_kernel
        in_specs.append(pl.BlockSpec((1, h, w), lambda i: (i, 0, 0)))
        operands.append(add.astype(jnp.float32))
    return pl.pallas_call(
        kernel,
        grid=(n,),
        in_specs=in_specs,
        out_specs=pl.BlockSpec((1, h, w), lambda i: (i, 0, 0)),
        out_shape=jax.ShapeDtypeStruct((n, h, w), jnp.float32),
        compiler_params=_cparams("parallel"),
    )(*operands)


# ----------------------------------------------------------------------------
# Kernel 4: final fuse  out = att * relu(BN(mid)) + relu(BN(b1))
# ----------------------------------------------------------------------------
def _final_fuse_kernel(zm_ref, att_ref, zb_ref, sm_ref, bm_ref, sb1_ref,
                       bb1_ref, o_ref):
    mid = jnp.maximum(zm_ref[0].astype(jnp.float32) * sm_ref[...] + bm_ref[...],
                      0.0)                                      # (TILE, Coutp)
    b1 = jnp.maximum(zb_ref[0] * sb1_ref[...] + bb1_ref[...], 0.0)  # (1, Coutp)
    o_ref[0] = att_ref[0] * mid + b1                            # lane broadcast


def final_fuse(z_mid, att, z_b1, sc_mid, sh_mid, sc_b1, sh_b1):
    n, hw, coutp = z_mid.shape
    tile, rows_p = _row_tiling(hw)
    t_steps = rows_p // tile
    zp = _pad_rows(z_mid, rows_p)
    ap = _pad_rows(att, rows_p)
    out = pl.pallas_call(
        _final_fuse_kernel,
        grid=(n, t_steps),
        in_specs=[
            pl.BlockSpec((1, tile, coutp), lambda i, t: (i, t, 0)),
            pl.BlockSpec((1, tile, 1), lambda i, t: (i, t, 0)),
            pl.BlockSpec((1, 1, coutp), lambda i, t: (i, 0, 0)),
            pl.BlockSpec((1, coutp), lambda i, t: (0, 0)),
            pl.BlockSpec((1, coutp), lambda i, t: (0, 0)),
            pl.BlockSpec((1, coutp), lambda i, t: (0, 0)),
            pl.BlockSpec((1, coutp), lambda i, t: (0, 0)),
        ],
        out_specs=pl.BlockSpec((1, tile, coutp), lambda i, t: (i, t, 0)),
        out_shape=jax.ShapeDtypeStruct((n, rows_p, coutp), jnp.float32),
        compiler_params=_cparams("parallel", "parallel"),
    )(zp, ap, z_b1, sc_mid, sh_mid, sc_b1, sh_b1)
    return out[:, :hw] if rows_p != hw else out


# ----------------------------------------------------------------------------
# Parameters (PyTorch default inits) and the FPABlock forward pass
# ----------------------------------------------------------------------------
def init_params(key, in_channels, out_channels):
    cinp = _round_up(in_channels, 8)
    coutp = _round_up(out_channels, _LANES)
    keys = iter(jax.random.split(key, 16))

    def _uniform(k, shape, fan_in):
        bound = 1.0 / (fan_in ** 0.5)
        return jax.random.uniform(k, shape, jnp.float32, -bound, bound)

    def dense_stage(cin, cout):  # 1x1 conv, channels padded to lane boundary
        w = _uniform(next(keys), (cin, cout), cin)
        b = _uniform(next(keys), (cout,), cin)
        return {
            "w": jnp.pad(w, ((0, cinp - cin), (0, coutp - cout))),
            "b": jnp.pad(b, (0, coutp - cout)),
            "gamma": jnp.pad(jnp.ones((cout,), jnp.float32), (0, coutp - cout)),
            "beta": jnp.zeros((coutp,), jnp.float32),
        }

    def spatial_stage(cin, k):   # KxK conv with a single output channel
        fan = cin * k * k
        return {
            "w": _uniform(next(keys), (cin, k, k), fan),
            "b": _uniform(next(keys), (), fan),
            "gamma": 1.0,
            "beta": 0.0,
        }

    return {
        "cin": in_channels, "cinp": cinp, "cout": out_channels, "coutp": coutp,
        "mid": dense_stage(in_channels, out_channels),
        "b1": dense_stage(in_channels, out_channels),
        "d1": spatial_stage(in_channels, 7),
        "d2": spatial_stage(1, 5),
        "d3a": spatial_stage(1, 3),
        "d3b": spatial_stage(1, 3),
        "c2": spatial_stage(1, 5),
        "c1": spatial_stage(1, 7),
    }


def fpa_block_forward(params, x_nchw):
    x_nchw = x_nchw.astype(jnp.float32)
    n, cin, h, w = x_nchw.shape
    cinp, cout, coutp = params["cinp"], params["cout"], params["coutp"]
    hw = h * w

    # ---- mid: 1x1 ConvBnRelu at full resolution (+ fused global avg pool) --
    x_rows = jnp.transpose(x_nchw, (0, 2, 3, 1)).reshape(n, hw, cin)
    if cinp != cin:
        x_rows = jnp.pad(x_rows, ((0, 0), (0, 0), (0, cinp - cin)))
    pm = params["mid"]
    z_mid, s1, s2, psum = dense_conv_bn_stats(x_rows, pm["w"], pm["b"],
                                              z_dtype=jnp.bfloat16)
    sc_mid, sh_mid = _bn_affine(s1, s2, n * hw, pm["gamma"], pm["beta"])

    # ---- branch1: AdaptiveAvgPool2d(1) -> 1x1 ConvBnRelu (ReLU in the fuse) -
    pb = params["b1"]
    pooled = (psum / float(hw)).reshape(1, n, cinp)
    z_b1, s1, s2, _ = dense_conv_bn_stats(pooled, pb["w"], pb["b"])
    sc_b1, sh_b1 = _bn_affine(s1, s2, n, pb["gamma"], pb["beta"])
    z_b1 = z_b1.reshape(n, 1, coutp)

    # ---- down / up attention path (all single-output-channel convs) --------
    def conv_bn_relu_spatial(x_in, p, add=None):
        z, ss1, ss2 = spatial_conv_bn_stats(x_in, p["w"], p["b"])
        sc, sh = _bn_affine(ss1, ss2, float(z.size), p["gamma"], p["beta"])
        return affine_relu(z, sc, sh, add=add)

    x1 = conv_bn_relu_spatial(_maxpool2(x_nchw), params["d1"])        # (N,H/2,W/2)
    x2 = conv_bn_relu_spatial(_maxpool2(x1[:, None]), params["d2"])   # (N,H/4,W/4)
    x3 = conv_bn_relu_spatial(_maxpool2(x2[:, None]), params["d3a"])  # (N,H/8,W/8)
    x3 = conv_bn_relu_spatial(x3[:, None], params["d3b"])             # (N,H/8,W/8)

    x3u = _bilinear_align_corners(x3, (h // 4, w // 4))
    t2 = conv_bn_relu_spatial(x2[:, None], params["c2"], add=x3u)     # (N,H/4,W/4)
    t2u = _bilinear_align_corners(t2, (h // 2, w // 2))
    t1 = conv_bn_relu_spatial(x1[:, None], params["c1"], add=t2u)     # (N,H/2,W/2)
    att = _bilinear_align_corners(t1, (h, w)).reshape(n, hw, 1)

    # ---- out = att * relu(BN(mid)) + relu(BN(b1))  (single fused kernel) ---
    out_rows = final_fuse(z_mid, att, z_b1, sc_mid, sh_mid, sc_b1, sh_b1)
    out = out_rows[:, :, :cout].reshape(n, h, w, cout)
    return jnp.transpose(out, (0, 3, 1, 2))


if __name__ == "__main__":
    in_channels, out_channels = 4, 8
    N, H, W = 2, 16, 16

    key = jax.random.PRNGKey(0)
    kp, kx = jax.random.split(key)
    params = init_params(kp, in_channels, out_channels)
    x = jax.random.normal(kx, (N, in_channels, H, W), jnp.float32)

    out = fpa_block_forward(params, x)
    out = jax.block_until_ready(out)
    assert out.shape == (N, out_channels, H, W), out.shape
    assert bool(jnp.all(jnp.isfinite(out)))
    print("KERNEL_OK")
</pallas_src>

<mosaic_0001>
module attributes {stable_mosaic.version = 11 : i64} {
  func.func @_dense_stats_kernel(%arg0: i32, %arg1: i32, %arg2: memref<1x256x8xbf16, #tpu.memory_space<vmem>>, %arg3: memref<8x128xbf16, #tpu.memory_space<vmem>>, %arg4: memref<1x128xf32, #tpu.memory_space<vmem>>, %arg5: memref<1x256x128xbf16, #tpu.memory_space<vmem>>, %arg6: memref<1x1x128xf32, #tpu.memory_space<vmem>>, %arg7: memref<1x1x128xf32, #tpu.memory_space<vmem>>, %arg8: memref<1x1x8xf32, #tpu.memory_space<vmem>>) attributes {dimension_semantics = [#tpu.dimension_semantics<parallel>, #tpu.dimension_semantics<arbitrary>], iteration_bounds = array<i64: 2, 1>, scalar_prefetch = 0 : i64, scratch_operands = 0 : i64, tpu.core_type = #tpu.core_type<tc>, window_params = [{transform_indices = @transform_0, window_bounds = array<i64: 1, 256, 8>}, {pipeline_mode = #tpu.pipeline_mode<synchronous>, transform_indices = @transform_1, window_bounds = array<i64: 8, 128>}, {pipeline_mode = #tpu.pipeline_mode<synchronous>, transform_indices = @transform_2, window_bounds = array<i64: 1, 128>}, {transform_indices = @transform_3, window_bounds = array<i64: 1, 256, 128>}, {transform_indices = @transform_4, window_bounds = array<i64: 1, 1, 128>}, {transform_indices = @transform_5, window_bounds = array<i64: 1, 1, 128>}, {transform_indices = @transform_6, window_bounds = array<i64: 1, 1, 8>}]} {
    %c0_i32 = arith.constant 0 : i32
    %0 = arith.cmpi eq, %arg1, %c0_i32 : i32
    %1 = arith.extui %0 : i1 to i32
    %c0_i32_0 = arith.constant 0 : i32
    %2 = arith.cmpi ne, %1, %c0_i32_0 : i32
    scf.if %2 {
      %cst_32 = arith.constant 0.000000e+00 : f32
      %52 = vector.broadcast %cst_32 : f32 to vector<1x1x128xf32>
      %c0_33 = arith.constant 0 : index
      %c0_34 = arith.constant 0 : index
      %c0_35 = arith.constant 0 : index
      %53 = vector.load %arg6[%c0_33, %c0_34, %c0_35] : memref<1x1x128xf32, #tpu.memory_space<vmem>>, vector<1x1x128xf32>
      tpu.vector_store %arg6[%c0_33, %c0_34, %c0_35], %52 {strides = array<i32>} : memref<1x1x128xf32, #tpu.memory_space<vmem>>, vector<1x1x128xf32>,
      %cst_36 = arith.constant 0.000000e+00 : f32
      %54 = vector.broadcast %cst_36 : f32 to vector<1x1x128xf32>
      %c0_37 = arith.constant 0 : index
      %c0_38 = arith.constant 0 : index
      %c0_39 = arith.constant 0 : index
      %55 = vector.load %arg7[%c0_37, %c0_38, %c0_39] : memref<1x1x128xf32, #tpu.memory_space<vmem>>, vector<1x1x128xf32>
      tpu.vector_store %arg7[%c0_37, %c0_38, %c0_39], %54 {strides = array<i32>} : memref<1x1x128xf32, #tpu.memory_space<vmem>>, vector<1x1x128xf32>,
      %cst_40 = arith.constant 0.000000e+00 : f32
      %56 = vector.broadcast %cst_40 : f32 to vector<1x1x8xf32>
      %c0_41 = arith.constant 0 : index
      %c0_42 = arith.constant 0 : index
      %c0_43 = arith.constant 0 : index
      %57 = vector.load %arg8[%c0_41, %c0_42, %c0_43] : memref<1x1x8xf32, #tpu.memory_space<vmem>>, vector<1x1x8xf32>
      tpu.vector_store %arg8[%c0_41, %c0_42, %c0_43], %56 {strides = array<i32>} : memref<1x1x8xf32, #tpu.memory_space<vmem>>, vector<1x1x8xf32>,
    } else {
    }
    %c0 = arith.constant 0 : index
    %c0_1 = arith.constant 0 : index
    %c0_2 = arith.constant 0 : index
    %3 = vector.load %arg2[%c0, %c0_1, %c0_2] : memref<1x256x8xbf16, #tpu.memory_space<vmem>>, vector<1x256x8xbf16>
    %4 = vector.shape_cast %3 : vector<1x256x8xbf16> to vector<256x8xbf16>
    %c0_3 = arith.constant 0 : index
    %c0_4 = arith.constant 0 : index
    %5 = vector.load %arg3[%c0_3, %c0_4] : memref<8x128xbf16, #tpu.memory_space<vmem>>, vector<8x128xbf16>
    %cst = arith.constant dense<0.000000e+00> : vector<256x128xf32>
    %6 = tpu.matmul %4, %5, %cst {dimension_numbers = #tpu.dot_dimension_numbers<[1], [0], [0], [1], [0, 0, 1, 1], [], []>} : vector<256x8xbf16>, vector<8x128xbf16>, vector<256x128xf32> -> vector<256x128xf32>
    %c0_5 = arith.constant 0 : index
    %c0_6 = arith.constant 0 : index
    %7 = vector.load %arg4[%c0_5, %c0_6] : memref<1x128xf32, #tpu.memory_space<vmem>>, vector<1x128xf32>
    %8 = vector.broadcast %7 : vector<1x128xf32> to vector<256x128xf32>
    %9 = arith.addf %6, %8 : vector<256x128xf32>
    %10 = arith.truncf %9 : vector<256x128xf32> to vector<256x128xbf16>
    %c0_7 = arith.constant 0 : index
    %c0_8 = arith.constant 0 : index
    %c0_9 = arith.constant 0 : index
    %11 = vector.load %arg5[%c0_7, %c0_8, %c0_9] : memref<1x256x128xbf16, #tpu.memory_space<vmem>>, vector<1x256x128xbf16>
    %12 = vector.shape_cast %11 : vector<1x256x128xbf16> to vector<256x128xbf16>
    %13 = vector.shape_cast %10 : vector<256x128xbf16> to vector<1x256x128xbf16>
    tpu.vector_store %arg5[%c0_7, %c0_8, %c0_9], %13 {strides = array<i32>} : memref<1x256x128xbf16, #tpu.memory_space<vmem>>, vector<1x256x128xbf16>,
    %14 = tpu.iota {dimensions = array<i32: 0>} : vector<256x1xi32>
    %c256_i32 = arith.constant 256 : i32
    %15 = arith.muli %arg1, %c256_i32 : i32
    %16 = vector.broadcast %15 : i32 to vector<256x1xi32>
    %17 = arith.addi %14, %16 : vector<256x1xi32>
    %c256_i32_10 = arith.constant 256 : i32
    %18 = vector.broadcast %c256_i32_10 : i32 to vector<256x1xi32>
    %19 = arith.cmpi slt, %17, %18 : vector<256x1xi32>
    %20 = arith.extui %19 : vector<256x1xi1> to vector<256x1xi32>
    %21 = arith.sitofp %20 : vector<256x1xi32> to vector<256x1xf32>
    %22 = vector.broadcast %21 : vector<256x1xf32> to vector<256x128xf32>
    %23 = arith.mulf %9, %22 : vector<256x128xf32>
    %c0_11 = arith.constant 0 : index
    %c0_12 = arith.constant 0 : index
    %c0_13 = arith.constant 0 : index
    %24 = vector.load %arg6[%c0_11, %c0_12, %c0_13] : memref<1x1x128xf32, #tpu.memory_space<vmem>>, vector<1x1x128xf32>
    %25 = vector.shape_cast %24 : vector<1x1x128xf32> to vector<1x128xf32>
    %cst_14 = arith.constant dense<0.000000e+00> : vector<128xf32>
    %26 = vector.multi_reduction <add>, %23, %cst_14 [0] : vector<256x128xf32> to vector<128xf32>
    %27 = vector.shape_cast %26 : vector<128xf32> to vector<1x128xf32>
    %28 = arith.addf %25, %27 : vector<1x128xf32>
    %c0_15 = arith.constant 0 : index
    %c0_16 = arith.constant 0 : index
    %c0_17 = arith.constant 0 : index
    %29 = vector.load %arg6[%c0_15, %c0_16, %c0_17] : memref<1x1x128xf32, #tpu.memory_space<vmem>>, vector<1x1x128xf32>
    %30 = vector.shape_cast %29 : vector<1x1x128xf32> to vector<1x128xf32>
    %31 = vector.shape_cast %28 : vector<1x128xf32> to vector<1x1x128xf32>
    tpu.vector_store %arg6[%c0_15, %c0_16, %c0_17], %31 {strides = array<i32>} : memref<1x1x128xf32, #tpu.memory_space<vmem>>, vector<1x1x128xf32>,
    %c0_18 = arith.constant 0 : index
    %c0_19 = arith.constant 0 : index
    %c0_20 = arith.constant 0 : index
    %32 = vector.load %arg7[%c0_18, %c0_19, %c0_20] : memref<1x1x128xf32, #tpu.memory_space<vmem>>, vector<1x1x128xf32>
    %33 = vector.shape_cast %32 : vector<1x1x128xf32> to vector<1x128xf32>
    %34 = arith.mulf %23, %9 : vector<256x128xf32>
    %cst_21 = arith.constant dense<0.000000e+00> : vector<128xf32>
    %35 = vector.multi_reduction <add>, %34, %cst_21 [0] : vector<256x128xf32> to vector<128xf32>
    %36 = vector.shape_cast %35 : vector<128xf32> to vector<1x128xf32>
    %37 = arith.addf %33, %36 : vector<1x128xf32>
    %c0_22 = arith.constant 0 : index
    %c0_23 = arith.constant 0 : index
    %c0_24 = arith.constant 0 : index
    %38 = vector.load %arg7[%c0_22, %c0_23, %c0_24] : memref<1x1x128xf32, #tpu.memory_space<vmem>>, vector<1x1x128xf32>
    %39 = vector.shape_cast %38 : vector<1x1x128xf32> to vector<1x128xf32>
    %40 = vector.shape_cast %37 : vector<1x128xf32> to vector<1x1x128xf32>
    tpu.vector_store %arg7[%c0_22, %c0_23, %c0_24], %40 {strides = array<i32>} : memref<1x1x128xf32, #tpu.memory_space<vmem>>, vector<1x1x128xf32>,
    %c0_25 = arith.constant 0 : index
    %c0_26 = arith.constant 0 : index
    %c0_27 = arith.constant 0 : index
    %41 = vector.load %arg8[%c0_25, %c0_26, %c0_27] : memref<1x1x8xf32, #tpu.memory_space<vmem>>, vector<1x1x8xf32>
    %42 = vector.shape_cast %41 : vector<1x1x8xf32> to vector<1x8xf32>
    %43 = arith.extf %4 : vector<256x8xbf16> to vector<256x8xf32>
    %44 = vector.broadcast %21 : vector<256x1xf32> to vector<256x8xf32>
    %45 = arith.mulf %43, %44 : vector<256x8xf32>
    %cst_28 = arith.constant dense<0.000000e+00> : vector<8xf32>
    %46 = vector.multi_reduction <add>, %45, %cst_28 [0] : vector<256x8xf32> to vector<8xf32>
    %47 = vector.shape_cast %46 : vector<8xf32> to vector<1x8xf32>
    %48 = arith.addf %42, %47 : vector<1x8xf32>
    %c0_29 = arith.constant 0 : index
    %c0_30 = arith.constant 0 : index
    %c0_31 = arith.constant 0 : index
    %49 = vector.load %arg8[%c0_29, %c0_30, %c0_31] : memref<1x1x8xf32, #tpu.memory_space<vmem>>, vector<1x1x8xf32>
    %50 = vector.shape_cast %49 : vector<1x1x8xf32> to vector<1x8xf32>
    %51 = vector.shape_cast %48 : vector<1x8xf32> to vector<1x1x8xf32>
    tpu.vector_store %arg8[%c0_29, %c0_30, %c0_31], %51 {strides = array<i32>} : memref<1x1x8xf32, #tpu.memory_space<vmem>>, vector<1x1x8xf32>,
    return
  }
  func.func @transform_0(%arg0: i32, %arg1: i32) -> (i32, i32, i32) {
    %c0_i32 = arith.constant 0 : i32
    %c0_i32_0 = arith.constant 0 : i32
    return %arg0, %arg1, %c0_i32 : i32, i32, i32
  }
  func.func @transform_1(%arg0: i32, %arg1: i32) -> (i32, i32) {
    %c0_i32 = arith.constant 0 : i32
    %c0_i32_0 = arith.constant 0 : i32
    %c0_i32_1 = arith.constant 0 : i32
    return %c0_i32, %c0_i32_0 : i32, i32
  }
  func.func @transform_2(%arg0: i32, %arg1: i32) -> (i32, i32) {
    %c0_i32 = arith.constant 0 : i32
    %c0_i32_0 = arith.constant 0 : i32
    %c0_i32_1 = arith.constant 0 : i32
    return %c0_i32, %c0_i32_0 : i32, i32
  }
  func.func @transform_3(%arg0: i32, %arg1: i32) -> (i32, i32, i32) {
    %c0_i32 = arith.constant 0 : i32
    %c0_i32_0 = arith.constant 0 : i32
    return %arg0, %arg1, %c0_i32 : i32, i32, i32
  }
  func.func @transform_4(%arg0: i32, %arg1: i32) -> (i32, i32, i32) {
    %c0_i32 = arith.constant 0 : i32
    %c0_i32_0 = arith.constant 0 : i32
    %c0_i32_1 = arith.constant 0 : i32
    return %arg0, %c0_i32, %c0_i32_0 : i32, i32, i32
  }
  func.func @transform_5(%arg0: i32, %arg1: i32) -> (i32, i32, i32) {
    %c0_i32 = arith.constant 0 : i32
    %c0_i32_0 = arith.constant 0 : i32
    %c0_i32_1 = arith.constant 0 : i32
    return %arg0, %c0_i32, %c0_i32_0 : i32, i32, i32
  }
  func.func @transform_6(%arg0: i32, %arg1: i32) -> (i32, i32, i32) {
    %c0_i32 = arith.constant 0 : i32
    %c0_i32_0 = arith.constant 0 : i32
    %c0_i32_1 = arith.constant 0 : i32
    return %arg0, %c0_i32, %c0_i32_0 : i32, i32, i32
  }
}

</mosaic_0001>

<bundles_post_ra>
// kernel: tpu_custom_call.1
= control target key start
LH: loop header
LB: loop body
LE: loop exit
PB: predicated region body
PF: predicated region fallthrough
CT: control target
= control target key end

     0   :  { %s2526_s0 = inlined_call_operand.vmem [shape: bf16[2,256,8], index: 0, kind: input, shape index: {}]   ;;  %s2527_s1 = inlined_call_operand.vmem [shape: bf16[8,128], index: 1, kind: input, shape index: {}]   ;;  %s2528_s2 = inlined_call_operand.vmem [shape: f32[1,128], index: 2, kind: input, shape index: {}]   ;;  %s2529_s3 = inlined_call_operand.hbm [shape: bf16[2,256,128], index: 3, kind: output, shape index: {0}]   ;;  %s2530_s4 = inlined_call_operand.hbm [shape: f32[2,1,128], index: 4, kind: output, shape index: {1}]   ;;  %s2531_s5 = inlined_call_operand.hbm [shape: f32[2,1,128], index: 5, kind: output, shape index: {2}]   ;;  %s2532_s6 = inlined_call_operand.hbm [shape: f32[2,1,8], index: 6, kind: output, shape index: {3}]  }
   0x1   :  { %2535 = sst [smem:[#allocation12_spill]] %s2526_s0 }
   0x2   :  { %12 = vsyncpa [#allocation3], 0 }
   0x3   :  { %14 = vsyncpa [#allocation3 + $0x1], 0 }
   0x4   :  { %15 = vsyncpa [#allocation5], 0 }
   0x5   :  { %17 = vsyncpa [#allocation5 + $0x1], 0 }
   0x6   :  { %18 = vsyncpa [#allocation8], 0 }
   0x7   :  { %20 = vsyncpa [#allocation8 + $0x1], 0  ;;  %s2064_s21 = smov 0   ;;  %s2066_s22 = smov 0  }
   0x8   :  { %s2068_s23 = smov 0   ;;  %s2070_s24 = smov 0  }
   0x9   :  { %s2072_s25 = smov 0   ;;  %s2074_s26 = smov 0  }
   0xa LB: > { %s2534_s27 = sadd.s32 4294967295, %s2020_s26   ;;  %s2533_s28 = sadd.s32 4294967294, %s2020_s26   ;;  %s2020_s26 = sphi %s2074_s26, %s26_s26   ;;  %s2016_s25 = sphi %s2072_s25, %s2545_s25   ;;  %s2012_s24 = sphi %s2070_s24, %s2544_s24   ;;  %s2008_s23 = sphi %s2068_s23, %s2543_s23   ;;  %s2004_s22 = sphi %s2066_s22, %s2542_s22   ;;  %s2000_s21 = sphi %s2064_s21, %s2541_s21  }
   0xb   : > { %s38_s29 = sadd.s32 1, %s2016_s25  ;;  %s117_s30 = sadd.s32 1, %s2008_s23 }
   0xc   : > { %p40_p0 = scmp.ge.s32.totalorder %s38_s29, 2  ;;  %p127_p1 = scmp.ne.s32.totalorder %s2008_s23, %s2004_s22 }
   0xd   : > { %p128_p2 = scmp.eq.s32.totalorder %s2534_s27, 1  ;;  %p133_p3 = scmp.ne.s32.totalorder %s2004_s22, %s2000_s21 }
   0xe   : > { %s2547_s29 = smov (%p40_p0, %s38_s29), 0  ;;  %p134_p5 = scmp.eq.s32.totalorder %s2533_s28, 1 }
   0xf   : > { %p2106_p4 = por %p128_p2, %p127_p1  ;;  %s112_s8 = ssub.s32 %s2016_s25, %s2547_s29 }
  0x10   : > { %p1484_p6 = scmp.ge.s32.totalorder %s2020_s26, 1  ;;  %p115_p7 = scmp.eq.s32.totalorder %s112_s8, 0 }
  0x11   : > { %p2115_p8 = por %p134_p5, %p133_p3  ;;  %p249_p9 = scmp.lt.s32.totalorder %s2020_s26, 3 }
  0x12   : > { %s2121_s10 = scalar_select %p115_p7, %s2008_s23, %s117_s30  }
  0x13   : > { %p250_p10 = pnand %p1484_p6, %p249_p9 }
  0x14   : > { %v347_v0 = vld [vmem:[%s2527_s1] sm:$0xf] (!%p250_p10)  ;;  %vm484_vm0 = vcmask (!%p250_p10), 1043456   ;;  %p296_p11 = scmp.lt.s32.totalorder (!%p250_p10), %s2012_s24, 1  ;;  %s2538_s0 = sld [smem:[#allocation12_spill]] (!%p250_p10)  ;;  %vm435_vm1 = vcmask (!%p250_p10), 64512  }
  0x15   : > { %253 = sbr.rel (%p250_p10) target bundleno = 374 (0x176), region = 32  ;;  %1743 = vmatprep.subr.msk.bf16.mxu0 (!%p250_p10), %vm484_vm0, %v347_v0  ;;  %v486_v1 = vsel (!%p250_p10), %vm484_vm0, %v347_v0, 0  ;;  %1744 = vmatprep.subr.msk.bf16.mxu1 (!%p250_p10), %vm484_vm0, %v347_v0  ;;  %s2206_s18 = sand.u32 (!%p250_p10), 1, %s2004_s22   ;;  %vm313_vm2 = vcmask (!%p250_p10), 57344  }
  0x16   : > { %1708 = vmatpush3.bf16.msra.mxu0 (!%p250_p10), %v486_v1  ;;  %1742 = vmatpush3.bf16.msra.mxu1 (!%p250_p10), %v486_v1  ;;  %s2209_s19 = scalar_lea.vmem (!%p250_p10), [#allocation4], %s2206_s18  ;;  %s2213_s20 = scalar_lea.vmem (!%p250_p10), [#allocation6], %s2206_s18 }
  0x17   : > { %s294_s30 = scalar_lea.vmem (!%p250_p10), [#allocation7], %s2206_s18  ;;  %s2218_s8 = sshll.u32 (!%p250_p10), %s2012_s24, 4 }
  0x18   : > { %s1267_s15 = scalar_lea.sflag (!%p250_p10), [#allocation8], %s2206_s18 }
  0x1c   : > { %s297_s13 = scalar_select %p296_p11, %s2012_s24, 1 }
  0x1e   : > { %s1561_s14 = sshll.u32 %s297_s13, 7  ;;  %s2224_s13 = scalar_lea.hbm %s2532_s6, %s2218_s8 }
  0x1f   : > { %s2131_s17 = scalar_lea.vmem %s2538_s0, %s1561_s14  ;;  %s1323_s14 = sshll.u32 %s294_s30, 4  ;;  %s1324_s14 = int_to_ptr.vmem [resolvable:$true] %s1323_s14 }
  0x20   : > { %v315_v2 = vld [vmem:[%s2131_s17] sm:$0xff]   ;;  %v317_v3 = vld [vmem:[%s2131_s17 + $0x8] sm:$0xff]   ;;  %v319_v4 = vld [vmem:[%s2131_s17 + $0x10] sm:$0xff]   ;;  %s1850_s16 = scalar_lea.vmem %s1324_s14, 16 }
  0x21   : > { %v1117_v5 = vunpack.c.l.bf16 %v315_v2  ;;  %v1118_v6 = vunpack.c.h.bf16 %v315_v2  ;;  %v1119_v7 = vunpack.c.l.bf16 %v317_v3  ;;  %v1120_v8 = vunpack.c.h.bf16 %v317_v3  ;;  %1709 = vmatprep.mubr.msk.bf16.mxu0 %vm435_vm1, %v315_v2  ;;  %v321_v14 = vld [vmem:[%s2131_s17 + $0x18] sm:$0xff]   ;;  %v323_v21 = vld [vmem:[%s2131_s17 + $0x20] sm:$0xff]   ;;  %v325_v25 = vld [vmem:[%s2131_s17 + $0x28] sm:$0xff]   ;;  %p1851_p12 = scmp.ne.s32.totalorder %s1324_s14, %s1850_s16 }
  0x22   : > { %v1121_v9 = vunpack.c.l.bf16 %v319_v4  ;;  %v1122_v13 = vunpack.c.h.bf16 %v319_v4  ;;  %1710 = vmatmul.mubr.msk.bf16.vlgmr.msra.gmra.mrb[0].mxu0 %vm435_vm1, %v317_v3  ;;  %v1123_v19 = vunpack.c.l.bf16 %v321_v14  ;;  %v1124_v20 = vunpack.c.h.bf16 %v321_v14  ;;  %v327_v33 = vld [vmem:[%s2131_s17 + $0x30] sm:$0xff]   ;;  %v331_v34 = vld [vmem:[%s2131_s17 + $0x40] sm:$0xff]   ;;  %v2159_v39 = vld [vmem:[%s2131_s17 + $0x38] sm:$0xff]  }
  0x23   : > { %v1181_v10 = vsel %vm435_vm1, %v1117_v5, 0.0  ;;  %v1182_v11 = vsel %vm435_vm1, %v1118_v6, 0.0  ;;  %v1184_v12 = vsel %vm435_vm1, %v1119_v7, 0.0  ;;  %v1186_v16 = vsel %vm435_vm1, %v1120_v8, 0.0  ;;  %1713 = vmatprep.mubr.msk.bf16.mxu0 %vm435_vm1, %v319_v4  ;;  %v333_v43 = vld [vmem:[%s2131_s17 + $0x48] sm:$0xff]   ;;  %v335_v47 = vld [vmem:[%s2131_s17 + $0x50] sm:$0xff]   ;;  %1725 = vmatprep.mubr.msk.bf16.mxu1 %vm435_vm1, %v331_v34  ;;  %p1852_p13 = pnand %p1851_p12, %p2106_p4 }
  0x24   : > { %v1183_v15 = vadd.f32 %v1182_v11, %v1181_v10  ;;  %v1188_v17 = vsel %vm435_vm1, %v1121_v9, 0.0  ;;  %v1190_v18 = vsel %vm435_vm1, %v1122_v13, 0.0  ;;  %v1125_v23 = vunpack.c.l.bf16 %v323_v21  ;;  %1726 = vmatmul.mubr.msk.bf16.vlgmr.msra.gmra.mrb[0].mxu1 %vm435_vm1, %v333_v43  ;;  %v337_v61 = vld [vmem:[%s2131_s17 + $0x58] sm:$0xff]   ;;  %v339_v1 = vld [vmem:[%s2131_s17 + $0x60] sm:$0xff]   ;;  %v341_v9 = vld [vmem:[%s2131_s17 + $0x68] sm:$0xff]  }
  0x25   : > { %v1126_v24 = vunpack.c.h.bf16 %v323_v21  ;;  %v1192_v26 = vsel %vm435_vm1, %v1123_v19, 0.0  ;;  %v1194_v27 = vsel %vm435_vm1, %v1124_v20, 0.0  ;;  %v1127_v28 = vunpack.c.l.bf16 %v325_v25  ;;  %1729 = vmatprep.mubr.msk.bf16.mxu1 %vm435_vm1, %v335_v47  ;;  %p1853_p0 = pneg %p1852_p13 }
  0x26   : > { %v1185_v22 = vadd.f32 %v1184_v12, %v1183_v15  ;;  %v1128_v29 = vunpack.c.h.bf16 %v325_v25  ;;  %v1196_v31 = vsel %vm435_vm1, %v1125_v23, 0.0  ;;  %v1129_v37 = vunpack.c.l.bf16 %v327_v33 }
  0x27   : > { %v1198_v32 = vsel %vm435_vm1, %v1126_v24, 0.0  ;;  %v1200_v35 = vsel %vm435_vm1, %v1127_v28, 0.0  ;;  %v1130_v38 = vunpack.c.h.bf16 %v327_v33  ;;  %v1131_v41 = vunpack.c.l.bf16 %v2159_v39 }
  0x28   : > { %v1187_v30 = vadd.f32 %v1186_v16, %v1185_v22  ;;  %v2156_v36 = vsel %vm435_vm1, %v1128_v29, 0.0  ;;  %v1132_v42 = vunpack.c.h.bf16 %v2159_v39  ;;  %v1204_v44 = vsel %vm435_vm1, %v1129_v37, 0.0 }
  0x29   : > { %v1206_v45 = vsel %vm435_vm1, %v1130_v38, 0.0  ;;  %v1133_v46 = vunpack.c.l.bf16 %v331_v34  ;;  %v1134_v49 = vunpack.c.h.bf16 %v331_v34  ;;  %v1135_v50 = vunpack.c.l.bf16 %v333_v43 }
  0x2a   : > { %v1189_v40 = vadd.f32 %v1188_v17, %v1187_v30  ;;  %1714 = vmatmul.mubr.msk.bf16.gmra.mrb[4].mxu0 %vm435_vm1, %v321_v14  ;;  %v1208_v51 = vsel %vm435_vm1, %v1131_v41, 0.0  ;;  %v1210_v52 = vsel %vm435_vm1, %v1132_v42, 0.0  ;;  %v1136_v54 = vunpack.c.h.bf16 %v333_v43  ;;  %v343_v14 = vld [vmem:[%s2131_s17 + $0x70] sm:$0xff]  }
  0x2b   : > { %1717 = vmatprep.mubr.msk.bf16.mxu0 %vm435_vm1, %v323_v21  ;;  %v1212_v53 = vsel %vm435_vm1, %v1133_v46, 0.0  ;;  %v1214_v56 = vsel %vm435_vm1, %v1134_v49, 0.0  ;;  %v1216_v57 = vsel %vm435_vm1, %v1135_v50, 0.0  ;;  %v1137_v59 = vunpack.c.l.bf16 %v335_v47 }
  0x2c   : > { %v1191_v48 = vadd.f32 %v1190_v18, %v1189_v40  ;;  %v1218_v58 = vsel %vm435_vm1, %v1136_v54, 0.0  ;;  %v1138_v60 = vunpack.c.h.bf16 %v335_v47  ;;  %v1139_v63 = vunpack.c.l.bf16 %v337_v61  ;;  %v345_v18 = vld [vmem:[%s2131_s17 + $0x78] sm:$0xff]   ;;  %1730 = vmatmul.mubr.msk.bf16.gmra.mrb[4].mxu1 %vm435_vm1, %v337_v61  ;;  %s2023_s17 = smov [#allocation7]  }
  0x2d   : > { %v1140_v0 = vunpack.c.h.bf16 %v337_v61  ;;  %v1220_v2 = vsel %vm435_vm1, %v1137_v59, 0.0  ;;  %v1141_v4 = vunpack.c.l.bf16 %v339_v1  ;;  %v1142_v5 = vunpack.c.h.bf16 %v339_v1  ;;  %1733 = vmatprep.mubr.msk.bf16.mxu1 %vm435_vm1, %v339_v1  ;;  %s1854_s28 = sshll.u32 %s2023_s17, 4  ;;  %s1855_s28 = int_to_ptr.vmem [resolvable:$false] %s1854_s28 }
  0x2e   : > { %v1193_v55 = vadd.f32 %v1192_v26, %v1191_v48  ;;  %v1222_v3 = vsel %vm435_vm1, %v1138_v60, 0.0  ;;  %v1224_v7 = vsel %vm435_vm1, %v1139_v63, 0.0  ;;  %v1143_v12 = vunpack.c.l.bf16 %v341_v9  ;;  %s1856_s27 = scalar_lea.vmem %s1855_s28, 32  ;;  %p1857_p1 = scmp.lt.s32.totalorder %s1324_s14, %s1855_s28 }
  0x2f   : > { %v1226_v8 = vsel %vm435_vm1, %v1140_v0, 0.0  ;;  %v1228_v10 = vsel %vm435_vm1, %v1141_v4, 0.0  ;;  %v1230_v11 = vsel %vm435_vm1, %v1142_v5, 0.0  ;;  %v1144_v13 = vunpack.c.h.bf16 %v341_v9  ;;  %p1858_p2 = scmp.lt.s32.totalorder %s1856_s27, %s1850_s16 }
  0x30   : > { %v1195_v62 = vadd.f32 %v1194_v27, %v1193_v55  ;;  %v1145_v16 = vunpack.c.l.bf16 %v343_v14  ;;  %v1146_v17 = vunpack.c.h.bf16 %v343_v14  ;;  %v1232_v19 = vsel %vm435_vm1, %v1143_v12, 0.0 }
  0x31   : > { %v1234_v20 = vsel %vm435_vm1, %v1144_v13, 0.0  ;;  %v1147_v21 = vunpack.c.l.bf16 %v345_v18  ;;  %v1148_v26 = vunpack.c.h.bf16 %v345_v18  ;;  %p1859_p3 = por %p1858_p2, %p1857_p1 }
  0x32   : > { %v1197_v6 = vadd.f32 %v1196_v31, %v1195_v62  ;;  %1718 = vmatmul.mubr.msk.bf16.gmra.mrb[8].mxu0 %vm435_vm1, %v325_v25  ;;  %v1236_v23 = vsel %vm435_vm1, %v1145_v16, 0.0  ;;  %v1238_v24 = vsel %vm435_vm1, %v1146_v17, 0.0 }
  0x33   : > { %1721 = vmatprep.mubr.msk.bf16.mxu0 %vm435_vm1, %v327_v33  ;;  %v1240_v25 = vsel %vm435_vm1, %v1147_v21, 0.0  ;;  %v1242_v28 = vsel %vm435_vm1, %v1148_v26, 0.0  ;;  %p1860_p5 = pnand %p1859_p3, %p1853_p0 }
  0x34   : > { %v1199_v15 = vadd.f32 %v1198_v32, %v1197_v6  ;;  %1734 = vmatmul.mubr.msk.bf16.gmra.mrb[8].mxu1 %vm435_vm1, %v341_v9 }
  0x35   : > { %1737 = vmatprep.mubr.msk.bf16.mxu1 %vm435_vm1, %v343_v14 }
  0x36   : > { %v1201_v22 = vadd.f32 %v1200_v35, %v1199_v15 }
  0x38   : > { %v1203_v27 = vadd.f32 %v2156_v36, %v1201_v22 }
  0x3a   : > { %v1205_v29 = vadd.f32 %v1204_v44, %v1203_v27  ;;  %1722 = vmatmul.mubr.msk.bf16.gmra.mrb[12].mxu0 %vm435_vm1, %v2159_v39 }
  0x3c   : > { %v1207_v30 = vadd.f32 %v1206_v45, %v1205_v29  ;;  %1738 = vmatmul.mubr.msk.bf16.gmra.mrb[12].mxu1 %vm435_vm1, %v345_v18 }
  0x3e   : > { %v1209_v31 = vadd.f32 %v1208_v51, %v1207_v30 }
  0x40   : > { %v1211_v32 = vadd.f32 %v1210_v52, %v1209_v31  ;;  %v2022_v52 = vmov 0.0  }
  0x41   : > { %311 = vst [vmem:[%s2209_s19] sm:$0x1] %v2022_v52  ;;  %312 = vst [vmem:[%s2213_s20] sm:$0x1] %v2022_v52 }
  0x42   : > { %v1213_v33 = vadd.f32 %v1212_v53, %v1211_v32  ;;  %314 = vst.msk [vmem:[%s294_s30] sm:$0x1] %vm313_vm2, %v2022_v52 }
  0x44   : > { %v1215_v34 = vadd.f32 %v1214_v56, %v1213_v33 }
  0x46   : > { %v1217_v35 = vadd.f32 %v1216_v57, %v1215_v34 }
  0x48   : > { %v1219_v36 = vadd.f32 %v1218_v58, %v1217_v35 }
  0x49   : > { %v1116_v56 = vld [vmem:[%s294_s30] sm:$0x1] }
  0x4a   : > { %v1221_v37 = vadd.f32 %v1220_v2, %v1219_v36 }
  0x4c   : > { %v1223_v38 = vadd.f32 %v1222_v3, %v1221_v37 }
  0x4e   : > { %v1225_v40 = vadd.f32 %v1224_v7, %v1223_v38 }
  0x50   : > { %v1227_v41 = vadd.f32 %v1226_v8, %v1225_v40 }
  0x52   : > { %v1229_v42 = vadd.f32 %v1228_v10, %v1227_v41 }
  0x54   : > { %v1231_v39 = vadd.f32 %v1230_v11, %v1229_v42 }
  0x56   : > { %v1233_v43 = vadd.f32 %v1232_v19, %v1231_v39 }
  0x58   : > { %v1235_v44 = vadd.f32 %v1234_v20, %v1233_v43 }
  0x5a   : > { %v1237_v45 = vadd.f32 %v1236_v23, %v1235_v44 }
  0x5c   : > { %v1239_v46 = vadd.f32 %v1238_v24, %v1237_v45 }
  0x5e   : > { %v1241_v47 = vadd.f32 %v1240_v25, %v1239_v46 }
  0x60   : > { %v1243_v48 = vadd.f32 %v1242_v28, %v1241_v47 }
  0x62   : > { %v1244_v49 = vrot.slane %v1243_v48, 4 }
  0x64   : > { %v1245_v50 = vadd.f32 %v1244_v49, %v1243_v48 }
  0x66   : > { %v1246_v51 = vrot.slane %v1245_v50, 2 }
  0x68   : > { %v1247_v53 = vadd.f32 %v1246_v51, %v1245_v50 }
  0x6a   : > { %v1248_v54 = vrot.slane %v1247_v53, 1 }
  0x6c   : > { %v1249_v55 = vadd.f32 %v1248_v54, %v1247_v53 }
  0x6e   : > { %v1250_v57 = vadd.f32 %v1249_v55, %v1116_v56 }
  0x70   : > { %1252 = vst.msk [vmem:[%s294_s30] sm:$0x1] %vm313_vm2, %v1250_v57 }
  0x71   : > { %1863 = shalt.err (!%p1860_p5)
}
  0x72   : > { %s1864_s30 = scalar_lea.hbm %s2224_s13, 16  ;;  %s1868_s17 = scalar_lea.hbm %s2532_s6, 32 }
  0x73   : > { %p1865_p6 = scmp.ne.s32.totalorder %s2224_s13, %s1864_s30  ;;  %p1869_p10 = scmp.lt.u32.totalorder %s2224_s13, %s2532_s6 }
  0x74   : > { %p1870_p11 = scmp.lt.u32.totalorder %s1868_s17, %s1864_s30  ;;  %p1872_p13 = scmp.lt.u32.totalorder %s1864_s30, %s2224_s13 }
  0x75   : > { %p1866_p7 = pnand %p1865_p6, %p2106_p4 }
  0x76   : > { %p1871_p12 = por %p1870_p11, %p1869_p10 }
  0x77   : > { %p1867_p9 = pneg %p1866_p7 }
  0x78   : > { %p1873_p0 = por %p1872_p13, %p1871_p12 }
  0x7a   : > { %p1874_p1 = pnand %p1873_p0, %p1867_p9 }
  0x7c   : > { %1877 = shalt.err (!%p1874_p1)
}
  0x7d   : > { %1748 = dma.vmem_to_hbm [thread:$0]  (%p2106_p4), %s1324_s14, 16, %s2224_s13, %s1267_s15   ;;  %v2247_v58 = vld [vmem:[%s2528_s2] ss:$0 sm:$0xff] }
  0x7e   : > { %s1485_s0 = sshll.u32 %s2206_s18, 7  ;;  %s1594_s14 = sshll.u32 %s2012_s24, 11 }
  0x7f   : > { %s2254_s13 = scalar_lea.vmem [#allocation2], %s1485_s0  ;;  %s2358_s11 = scalar_lea.hbm %s2529_s3, %s1594_s14 }
  0x80   : > { %s1281_s15 = sshll.u32 %s2254_s13, 4  ;;  %s1254_s12 = scalar_lea.sflag [#allocation3], %s2206_s18  ;;  %s2362_s15 = int_to_ptr.vmem [resolvable:$true] %s1281_s15 }
  0x81   : > { %s1878_s17 = scalar_lea.vmem %s2362_s15, 2048  ;;  %s2024_s28 = smov [#allocation2]  }
  0x82   : > { %p1879_p2 = scmp.ne.s32.totalorder %s2362_s15, %s1878_s17  ;;  %s1882_s27 = sshll.u32 %s2024_s28, 4  ;;  %s1883_s27 = int_to_ptr.vmem [resolvable:$false] %s1882_s27 }
  0x83   : > { %s1884_s16 = scalar_lea.vmem %s1883_s27, 4096  ;;  %p1885_p6 = scmp.lt.s32.totalorder %s2362_s15, %s1883_s27 }
  0x84   : > { %p1880_p3 = pnand %p1879_p2, %p2106_p4  ;;  %p1886_p7 = scmp.lt.s32.totalorder %s1884_s16, %s1878_s17 }
  0x86   : > { %p1881_p5 = pneg %p1880_p3  ;;  %p1887_p9 = por %p1886_p7, %p1885_p6 }
  0x88   : > { %p1888_p10 = pnand %p1887_p9, %p1881_p5 }
  0xf5   : > { %v1711_v59 = vpop.f32.mrb[0].mxu0 }
  0xf6   : > { %v522_v60 = vpop.f32.mrb[1].mxu0  ;;  %v531_v63 = vadd.f32 %v1711_v59, %v2247_v58 }
  0xf7   : > { %v523_v61 = vadd.f32 %v2247_v58, %v522_v60  ;;  %v1712_v62 = vpop.f32.mrb[2].mxu0  ;;  %v1727_v21 = vpop.f32.mrb[0].mxu1 }
  0xf8   : > { %v534_v0 = vadd.f32 %v1712_v62, %v2247_v58  ;;  %v525_v1 = vpop.f32.mrb[3].mxu0  ;;  %v1047_v8 = vmul.f32 %v531_v63, %v531_v63  ;;  %v586_v25 = vpop.f32.mrb[1].mxu1  ;;  %v2263_v28 = vadd.f32 %v1727_v21, %v2247_v58 }
  0xf9   : > { %v526_v2 = vadd.f32 %v2247_v58, %v525_v1  ;;  %v1045_v4 = vmul.f32 %v523_v61, %v523_v61  ;;  %v2266_v29 = vadd.f32 %v2247_v58, %v586_v25  ;;  %v1728_v30 = vpop.f32.mrb[2].mxu1 }
  0xfa   : > { %v1603_v3 = vpack.c.bf16 %v534_v0, %v531_v63  ;;  %v1048_v13 = vmul.f32 %v534_v0, %v534_v0  ;;  %v589_v35 = vpop.f32.mrb[3].mxu1  ;;  %v2270_v36 = vadd.f32 %v1728_v30, %v2247_v58 }
  0xfb   : > { %v1598_v5 = vpack.c.bf16 %v526_v2, %v523_v61  ;;  %v1005_v6 = vadd.f32 %v526_v2, %v523_v61  ;;  %v1046_v7 = vmul.f32 %v526_v2, %v526_v2  ;;  %v2273_v37 = vadd.f32 %v2247_v58, %v589_v35 }
  0xfc   : > { %1675 = vst [vmem:[%s2254_s13 + $0x8] sm:$0xff] %v1603_v3   ;;  %v1643_v43 = vpack.c.bf16 %v2270_v36, %v2263_v28 }
  0xfd   : > { %1599 = vst [vmem:[%s2254_s13] sm:$0xff] %v1598_v5   ;;  %v1006_v9 = vadd.f32 %v1005_v6, %v531_v63  ;;  %v1077_v10 = vadd.f32 %v1046_v7, %v1045_v4  ;;  %v1715_v11 = vpop.f32.mrb[4].mxu0  ;;  %v1638_v44 = vpack.c.bf16 %v2273_v37, %v2266_v29 }
  0xfe   : > { %v538_v12 = vpop.f32.mrb[5].mxu0  ;;  %v547_v18 = vadd.f32 %v1715_v11, %v2247_v58  ;;  %1683 = vst [vmem:[%s2254_s13 + $0x48] sm:$0xff] %v1643_v43  }
  0xff   : > { %v1078_v14 = vadd.f32 %v1077_v10, %v1047_v8  ;;  %v539_v15 = vadd.f32 %v2247_v58, %v538_v12  ;;  %v1007_v16 = vadd.f32 %v1006_v9, %v534_v0  ;;  %v1716_v17 = vpop.f32.mrb[6].mxu0  ;;  %1682 = vst [vmem:[%s2254_s13 + $0x40] sm:$0xff] %v1638_v44   ;;  %v1731_v53 = vpop.f32.mrb[4].mxu1 }
 0x100   : > { %v550_v19 = vadd.f32 %v1716_v17, %v2247_v58  ;;  %v541_v20 = vpop.f32.mrb[7].mxu0  ;;  %v1051_v38 = vmul.f32 %v547_v18, %v547_v18  ;;  %v602_v59 = vpop.f32.mrb[5].mxu1  ;;  %v2287_v61 = vadd.f32 %v1731_v53, %v2247_v58 }
 0x101   : > { %v1008_v22 = vadd.f32 %v1007_v16, %v539_v15  ;;  %v1049_v23 = vmul.f32 %v539_v15, %v539_v15  ;;  %v1079_v24 = vadd.f32 %v1078_v14, %v1048_v13  ;;  %v542_v26 = vadd.f32 %v2247_v58, %v541_v20  ;;  %v1732_v63 = vpop.f32.mrb[6].mxu1 }
 0x102   : > { %v1613_v27 = vpack.c.bf16 %v550_v19, %v547_v18  ;;  %v1052_v45 = vmul.f32 %v550_v19, %v550_v19  ;;  %v2290_v62 = vadd.f32 %v2247_v58, %v602_v59  ;;  %v605_v4 = vpop.f32.mrb[7].mxu1  ;;  %v2294_v5 = vadd.f32 %v1732_v63, %v2247_v58 }
 0x103   : > { %v1080_v31 = vadd.f32 %v1079_v24, %v1049_v23  ;;  %v1608_v32 = vpack.c.bf16 %v542_v26, %v539_v15  ;;  %v1009_v33 = vadd.f32 %v1008_v22, %v542_v26  ;;  %v1050_v34 = vmul.f32 %v542_v26, %v542_v26 }
 0x104   : > { %1677 = vst [vmem:[%s2254_s13 + $0x18] sm:$0xff] %v1613_v27   ;;  %v2297_v6 = vadd.f32 %v2247_v58, %v605_v4  ;;  %v1653_v12 = vpack.c.bf16 %v2294_v5, %v2287_v61 }
 0x105   : > { %1676 = vst [vmem:[%s2254_s13 + $0x10] sm:$0xff] %v1608_v32   ;;  %v1010_v40 = vadd.f32 %v1009_v33, %v547_v18  ;;  %v1081_v41 = vadd.f32 %v1080_v31, %v1050_v34  ;;  %v1719_v42 = vpop.f32.mrb[8].mxu0 }
 0x106   : > { %v554_v39 = vpop.f32.mrb[9].mxu0  ;;  %v563_v50 = vadd.f32 %v1719_v42, %v2247_v58  ;;  %v1648_v13 = vpack.c.bf16 %v2297_v6, %v2290_v62  ;;  %1685 = vst [vmem:[%s2254_s13 + $0x58] sm:$0xff] %v1653_v12  }
 0x107   : > { %v1082_v46 = vadd.f32 %v1081_v41, %v1051_v38  ;;  %v555_v47 = vadd.f32 %v2247_v58, %v554_v39  ;;  %v1011_v48 = vadd.f32 %v1010_v40, %v550_v19  ;;  %v1720_v49 = vpop.f32.mrb[10].mxu0  ;;  %v1735_v22 = vpop.f32.mrb[8].mxu1 }
 0x108   : > { %v566_v51 = vadd.f32 %v1720_v49, %v2247_v58  ;;  %v557_v52 = vpop.f32.mrb[11].mxu0  ;;  %v1055_v7 = vmul.f32 %v563_v50, %v563_v50  ;;  %1684 = vst [vmem:[%s2254_s13 + $0x50] sm:$0xff] %v1648_v13   ;;  %v618_v27 = vpop.f32.mrb[9].mxu1  ;;  %v2311_v31 = vadd.f32 %v1735_v22, %v2247_v58 }
 0x109   : > { %v1012_v54 = vadd.f32 %v1011_v48, %v555_v47  ;;  %v1053_v55 = vmul.f32 %v555_v47, %v555_v47  ;;  %v1083_v56 = vadd.f32 %v1082_v46, %v1052_v45  ;;  %v558_v57 = vadd.f32 %v2247_v58, %v557_v52  ;;  %v1736_v33 = vpop.f32.mrb[10].mxu1 }
 0x10a   : > { %v1623_v60 = vpack.c.bf16 %v566_v51, %v563_v50  ;;  %v1056_v14 = vmul.f32 %v566_v51, %v566_v51  ;;  %v2314_v32 = vadd.f32 %v2247_v58, %v618_v27  ;;  %v621_v41 = vpop.f32.mrb[11].mxu1  ;;  %v2318_v42 = vadd.f32 %v1736_v33, %v2247_v58 }
 0x10b   : > { %v1084_v0 = vadd.f32 %v1083_v56, %v1053_v55  ;;  %v1618_v1 = vpack.c.bf16 %v558_v57, %v555_v47  ;;  %v1013_v2 = vadd.f32 %v1012_v54, %v558_v57  ;;  %v1054_v3 = vmul.f32 %v558_v57, %v558_v57 }
 0x10c   : > { %1679 = vst [vmem:[%s2254_s13 + $0x28] sm:$0xff] %v1623_v60   ;;  %v2321_v39 = vadd.f32 %v2247_v58, %v621_v41  ;;  %v1663_v46 = vpack.c.bf16 %v2318_v42, %v2311_v31 }
 0x10d   : > { %1678 = vst [vmem:[%s2254_s13 + $0x20] sm:$0xff] %v1618_v1   ;;  %v1014_v8 = vadd.f32 %v1013_v2, %v563_v50  ;;  %v1085_v9 = vadd.f32 %v1084_v0, %v1054_v3  ;;  %v1723_v10 = vpop.f32.mrb[12].mxu0  ;;  %v1062_v0 = vmul.f32 %v2273_v37, %v2273_v37  ;;  %v1063_v3 = vmul.f32 %v2263_v28, %v2263_v28 }
 0x10e   : > { %v570_v11 = vpop.f32.mrb[13].mxu0  ;;  %v579_v19 = vadd.f32 %v1723_v10, %v2247_v58  ;;  %v1658_v47 = vpack.c.bf16 %v2321_v39, %v2314_v32  ;;  %1687 = vst [vmem:[%s2254_s13 + $0x68] sm:$0xff] %v1663_v46   ;;  %v1065_v10 = vmul.f32 %v2290_v62, %v2290_v62 }
 0x10f   : > { %v1086_v15 = vadd.f32 %v1085_v9, %v1055_v7  ;;  %v571_v16 = vadd.f32 %v2247_v58, %v570_v11  ;;  %v1015_v17 = vadd.f32 %v1014_v8, %v566_v51  ;;  %v1724_v18 = vpop.f32.mrb[14].mxu0  ;;  %v1061_v51 = vmul.f32 %v2266_v29, %v2266_v29  ;;  %v1739_v52 = vpop.f32.mrb[12].mxu1 }
 0x110   : > { %v582_v20 = vadd.f32 %v1724_v18, %v2247_v58  ;;  %v573_v21 = vpop.f32.mrb[15].mxu0  ;;  %v1059_v43 = vmul.f32 %v579_v19, %v579_v19  ;;  %1686 = vst [vmem:[%s2254_s13 + $0x60] sm:$0xff] %v1658_v47   ;;  %v2334_v55 = vadd.f32 %v1739_v52, %v2247_v58  ;;  %v634_v56 = vpop.f32.mrb[13].mxu1 }
 0x111   : > { %v1016_v23 = vadd.f32 %v1015_v17, %v571_v16  ;;  %v1057_v24 = vmul.f32 %v571_v16, %v571_v16  ;;  %v1087_v26 = vadd.f32 %v1086_v15, %v1056_v14  ;;  %v574_v25 = vadd.f32 %v2247_v58, %v573_v21  ;;  %v1740_v59 = vpop.f32.mrb[14].mxu1 }
 0x112   : > { %v1633_v30 = vpack.c.bf16 %v582_v20, %v579_v19  ;;  %v1060_v48 = vmul.f32 %v582_v20, %v582_v20  ;;  %v2337_v57 = vadd.f32 %v2247_v58, %v634_v56  ;;  %v2344_v1 = vadd.f32 %v1740_v59, %v2247_v58 }
 0x113   : > { %v1088_v34 = vadd.f32 %v1087_v26, %v1057_v24  ;;  %v1628_v35 = vpack.c.bf16 %v574_v25, %v571_v16  ;;  %v1017_v38 = vadd.f32 %v1016_v23, %v574_v25  ;;  %v1058_v40 = vmul.f32 %v574_v25, %v574_v25 }
 0x114   : > { %1681 = vst [vmem:[%s2254_s13 + $0x38] sm:$0xff] %v1633_v30  }
 0x115   : > { %1680 = vst [vmem:[%s2254_s13 + $0x30] sm:$0xff] %v1628_v35   ;;  %v1018_v44 = vadd.f32 %v1017_v38, %v579_v19  ;;  %v1089_v45 = vadd.f32 %v1088_v34, %v1058_v40 }
 0x117   : > { %v1090_v49 = vadd.f32 %v1089_v45, %v1059_v43  ;;  %v1019_v50 = vadd.f32 %v1018_v44, %v582_v20 }
 0x119   : > { %v1020_v53 = vadd.f32 %v1019_v50, %v2266_v29  ;;  %v1091_v54 = vadd.f32 %v1090_v49, %v1060_v48  ;;  %v637_v29 = vpop.f32.mrb[15].mxu1 }
 0x11a   : > { %v2348_v2 = vadd.f32 %v2247_v58, %v637_v29 }
 0x11b   : > { %v1092_v60 = vadd.f32 %v1091_v54, %v1061_v51  ;;  %v1021_v63 = vadd.f32 %v1020_v53, %v2273_v37  ;;  %v1673_v37 = vpack.c.bf16 %v2344_v1, %v2334_v55 }
 0x11c   : > { %v1668_v58 = vpack.c.bf16 %v2348_v2, %v2337_v57 }
 0x11d   : > { %v1022_v4 = vadd.f32 %v1021_v63, %v2263_v28  ;;  %v1093_v7 = vadd.f32 %v1092_v60, %v1062_v0  ;;  %v1064_v28 = vmul.f32 %v2270_v36, %v2270_v36  ;;  %1689 = vst [vmem:[%s2254_s13 + $0x78] sm:$0xff] %v1673_v37  }
 0x11e   : > { %1688 = vst [vmem:[%s2254_s13 + $0x70] sm:$0xff] %v1668_v58  }
 0x11f   : > { %v1094_v8 = vadd.f32 %v1093_v7, %v1063_v3  ;;  %v1023_v9 = vadd.f32 %v1022_v4, %v2270_v36 }
 0x121   : > { %v1024_v11 = vadd.f32 %v1023_v9, %v2290_v62  ;;  %v1095_v12 = vadd.f32 %v1094_v8, %v1064_v28 }
 0x122   : > { %1891 = shalt.err (!%p1888_p10)
}
 0x123   : > { %s1892_s0 = scalar_lea.hbm %s2358_s11, 2048  ;;  %s1896_s24 = scalar_lea.hbm %s2529_s3, 4096 }
 0x124   : > { %p1893_p11 = scmp.ne.s32.totalorder %s2358_s11, %s1892_s0  ;;  %p1897_p0 = scmp.lt.u32.totalorder %s2358_s11, %s2529_s3 }
 0x125   : > { %p1898_p1 = scmp.lt.u32.totalorder %s1896_s24, %s1892_s0  ;;  %p1900_p3 = scmp.lt.u32.totalorder %s1892_s0, %s2358_s11 }
 0x126   : > { %p1894_p12 = pnand %p1893_p11, %p2106_p4 }
 0x127   : > { %p1899_p2 = por %p1898_p1, %p1897_p0 }
 0x128   : > { %p1895_p13 = pneg %p1894_p12 }
 0x129   : > { %p1901_p5 = por %p1900_p3, %p1899_p2 }
 0x12b   : > { %p1902_p6 = pnand %p1901_p5, %p1895_p13 }
 0x12d   : > { %1905 = shalt.err (!%p1902_p6)
}
 0x12e   : > { %s2025_s17 = smov 64   ;;  %s2026_s27 = smov 4   ;;  %v1096_v36 = vadd.f32 %v1095_v12, %v1065_v10  ;;  %v1025_v62 = vadd.f32 %v1024_v11, %v2297_v6  ;;  %v1066_v13 = vmul.f32 %v2297_v6, %v2297_v6  ;;  %v1067_v14 = vmul.f32 %v2287_v61, %v2287_v61  ;;  %v1044_v59 = vld [vmem:[%s2213_s20] sm:$0x1] }
 0x12f   : > { %1745 = dma.vmem_to_hbm [thread:$0]  (%p2106_p4), %s2362_s15, 2048, %s2358_s11, %s1254_s12, %s2025_s17, %s2025_s17, %s2026_s27   ;;  %v1068_v17 = vmul.f32 %v2294_v5, %v2294_v5  ;;  %v1069_v20 = vmul.f32 %v2314_v32, %v2314_v32  ;;  %v1070_v24 = vmul.f32 %v2321_v39, %v2321_v39  ;;  %v1074_v40 = vmul.f32 %v2348_v2, %v2348_v2 }
 0x130   : > { %v1026_v15 = vadd.f32 %v1025_v62, %v2287_v61  ;;  %v1097_v16 = vadd.f32 %v1096_v36, %v1066_v13  ;;  %v1071_v61 = vmul.f32 %v2311_v31, %v2311_v31  ;;  %s2539_s18 = sadd.s32 4294967295, %s2020_s26   ;;  %s1297_s11 = sshll.u32 %s2209_s19, 4  ;;  %s2443_s11 = int_to_ptr.vmem [resolvable:$true] %s1297_s11 }
 0x131   : > { %s2431_s15 = sand.u32 1, %s2539_s18   ;;  %s1310_s12 = sshll.u32 %s2213_s20, 4  ;;  %s2452_s12 = int_to_ptr.vmem [resolvable:$true] %s1310_s12 }
 0x132   : > { %v1098_v18 = vadd.f32 %v1097_v16, %v1067_v14  ;;  %v1027_v19 = vadd.f32 %v1026_v15, %v2294_v5  ;;  %v1072_v5 = vmul.f32 %v2318_v42, %v2318_v42  ;;  %s2441_s13 = scalar_lea.hbm %s2530_s4, %s2218_s8  ;;  %s2450_s30 = scalar_lea.hbm %s2531_s5, %s2218_s8 }
 0x133   : > { %s1259_s28 = scalar_lea.sflag [#allocation5], %s2431_s15  ;;  %s1906_s17 = scalar_lea.vmem %s2443_s11, 16 }
 0x134   : > { %v1028_v21 = vadd.f32 %v1027_v19, %v2314_v32  ;;  %v1099_v22 = vadd.f32 %v1098_v18, %v1068_v17  ;;  %v1073_v32 = vmul.f32 %v2337_v57, %v2337_v57  ;;  %p1907_p7 = scmp.ne.s32.totalorder %s2443_s11, %s1906_s17  ;;  %s2027_s27 = smov [#allocation4]  }
 0x135   : > { %s1910_s18 = sshll.u32 %s2027_s27, 4  ;;  %s1911_s18 = int_to_ptr.vmem [resolvable:$false] %s1910_s18 }
 0x136   : > { %v1100_v23 = vadd.f32 %v1099_v22, %v1069_v20  ;;  %v1029_v6 = vadd.f32 %v1028_v21, %v2321_v39  ;;  %v1076_v39 = vmul.f32 %v2344_v1, %v2344_v1  ;;  %p1908_p9 = pnand %p1907_p7, %p2106_p4  ;;  %s1912_s16 = scalar_lea.vmem %s1911_s18, 32 }
 0x137   : > { %p1913_p11 = scmp.lt.s32.totalorder %s2443_s11, %s1911_s18  ;;  %p1914_p12 = scmp.lt.s32.totalorder %s1912_s16, %s1906_s17 }
 0x138   : > { %v1030_v26 = vadd.f32 %v1029_v6, %v2311_v31  ;;  %v1101_v25 = vadd.f32 %v1100_v23, %v1070_v24  ;;  %v1075_v31 = vmul.f32 %v2334_v55, %v2334_v55  ;;  %p1909_p10 = pneg %p1908_p9 }
 0x139   : > { %p1915_p13 = por %p1914_p12, %p1913_p11 }
 0x13a   : > { %v1102_v27 = vadd.f32 %v1101_v25, %v1071_v61  ;;  %v1031_v30 = vadd.f32 %v1030_v26, %v2318_v42 }
 0x13b   : > { %p1916_p0 = pnand %p1915_p13, %p1909_p10 }
 0x13c   : > { %v1032_v33 = vadd.f32 %v1031_v30, %v2337_v57  ;;  %v1103_v34 = vadd.f32 %v1102_v27, %v1072_v5 }
 0x13e   : > { %v1104_v35 = vadd.f32 %v1103_v34, %v1073_v32  ;;  %v1033_v38 = vadd.f32 %v1032_v33, %v2348_v2 }
 0x140   : > { %v1034_v41 = vadd.f32 %v1033_v38, %v2334_v55  ;;  %v1105_v42 = vadd.f32 %v1104_v35, %v1074_v40  ;;  %v1004_v55 = vld [vmem:[%s2209_s19] sm:$0x1] }
 0x142   : > { %v1035_v43 = vadd.f32 %v1034_v41, %v2344_v1  ;;  %v1106_v44 = vadd.f32 %v1105_v42, %v1075_v31 }
 0x144   : > { %v1036_v45 = vrot.slane %v1035_v43, 4  ;;  %v1107_v46 = vadd.f32 %v1106_v44, %v1076_v39 }
 0x146   : > { %v1037_v47 = vadd.f32 %v1036_v45, %v1035_v43  ;;  %v1108_v48 = vrot.slane %v1107_v46, 4 }
 0x148   : > { %v1038_v49 = vrot.slane %v1037_v47, 2  ;;  %v1109_v50 = vadd.f32 %v1108_v48, %v1107_v46 }
 0x14a   : > { %v1110_v51 = vrot.slane %v1109_v50, 2  ;;  %v1039_v52 = vadd.f32 %v1038_v49, %v1037_v47 }
 0x14c   : > { %v1040_v53 = vrot.slane %v1039_v52, 1  ;;  %v1111_v54 = vadd.f32 %v1110_v51, %v1109_v50 }
 0x14e   : > { %v1041_v56 = vadd.f32 %v1040_v53, %v1039_v52  ;;  %v1112_v57 = vrot.slane %v1111_v54, 1 }
 0x150   : > { %v1042_v60 = vadd.f32 %v1041_v56, %v1004_v55  ;;  %v1113_v63 = vadd.f32 %v1112_v57, %v1111_v54 }
 0x152   : > { %1043 = vst [vmem:[%s2209_s19] sm:$0x1] %v1042_v60  ;;  %v1114_v0 = vadd.f32 %v1113_v63, %v1044_v59 }
 0x153   : > { %1919 = shalt.err (!%p1916_p0)
}
 0x154   : > { %s1920_s19 = scalar_lea.hbm %s2441_s13, 16  ;;  %s1924_s14 = scalar_lea.hbm %s2530_s4, 32 }
 0x155   : > { %p1921_p1 = scmp.ne.s32.totalorder %s2441_s13, %s1920_s19  ;;  %p1925_p5 = scmp.lt.u32.totalorder %s2441_s13, %s2530_s4 }
 0x156   : > { %p1926_p6 = scmp.lt.u32.totalorder %s1924_s14, %s1920_s19  ;;  %p1928_p9 = scmp.lt.u32.totalorder %s1920_s19, %s2441_s13 }
 0x157   : > { %p1922_p2 = pnand %p1921_p1, %p2106_p4 }
 0x158   : > { %p1927_p7 = por %p1926_p6, %p1925_p5 }
 0x159   : > { %p1923_p3 = pneg %p1922_p2 }
 0x15a   : > { %p1929_p10 = por %p1928_p9, %p1927_p7 }
 0x15c   : > { %p1930_p11 = pnand %p1929_p10, %p1923_p3 }
 0x15e   : > { %1933 = shalt.err (!%p1930_p11)
}
 0x15f   : > { %1746 = dma.vmem_to_hbm [thread:$0]  (%p2106_p4), %s2443_s11, 16, %s2441_s13, %s1259_s28   ;;  %1115 = vst [vmem:[%s2213_s20] sm:$0x1] %v1114_v0 }
 0x160   : > { %s1934_s17 = scalar_lea.vmem %s2452_s12, 16  ;;  %s2028_s18 = smov [#allocation6]  }
 0x161   : > { %p1935_p12 = scmp.ne.s32.totalorder %s2452_s12, %s1934_s17  ;;  %s1938_s16 = sshll.u32 %s2028_s18, 4  ;;  %s1939_s16 = int_to_ptr.vmem [resolvable:$false] %s1938_s16 }
 0x162   : > { %s1940_s19 = scalar_lea.vmem %s1939_s16, 32  ;;  %p1941_p1 = scmp.lt.s32.totalorder %s2452_s12, %s1939_s16 }
 0x163   : > { %p1936_p13 = pnand %p1935_p12, %p2106_p4  ;;  %p1942_p2 = scmp.lt.s32.totalorder %s1940_s19, %s1934_s17 }
 0x165   : > { %p1937_p0 = pneg %p1936_p13  ;;  %p1943_p3 = por %p1942_p2, %p1941_p1 }
 0x167   : > { %p1944_p5 = pnand %p1943_p3, %p1937_p0 }
 0x169   : > { %1947 = shalt.err (!%p1944_p5)
}
 0x16a   : > { %s1948_s20 = scalar_lea.hbm %s2450_s30, 16  ;;  %s1952_s8 = scalar_lea.hbm %s2531_s5, 32 }
 0x16b   : > { %p1949_p6 = scmp.ne.s32.totalorder %s2450_s30, %s1948_s20  ;;  %p1953_p10 = scmp.lt.u32.totalorder %s2450_s30, %s2531_s5 }
 0x16c   : > { %p1954_p11 = scmp.lt.u32.totalorder %s1952_s8, %s1948_s20  ;;  %p1956_p13 = scmp.lt.u32.totalorder %s1948_s20, %s2450_s30 }
 0x16d   : > { %p1950_p7 = pnand %p1949_p6, %p2106_p4 }
 0x16e   : > { %p1955_p12 = por %p1954_p11, %p1953_p10 }
 0x16f   : > { %p1951_p9 = pneg %p1950_p7 }
 0x170   : > { %p1957_p0 = por %p1956_p13, %p1955_p12 }
 0x172   : > { %p1958_p1 = pnand %p1957_p0, %p1951_p9 }
 0x174   : > { %1961 = shalt.err (!%p1958_p1)
}
 0x175   : > { %1747 = dma.vmem_to_hbm [thread:$0]  (%p2106_p4), %s2452_s12, 16, %s2450_s30, %s1259_s28  }
 0x176 PF: > { %p1766_p2 = scmp.ge.s32.totalorder %s2020_s26, 2  ;;  %s1335_s24 = sand.u32 1, %s2000_s21  }
 0x177   : > { %s1336_s27 = scalar_lea.sflag [#allocation3], %s1335_s24 }
 0x178   : > { %p1754_p3 = pnand %p1766_p2, %p2115_p8 }
 0x17a   : > { %1987 = dma.done.wait (!%p1754_p3), %s1336_s27, 2048  }
 0x17b   : > { %1989 = vsyncadd (!%p1754_p3), %s1336_s27, 4294965248  ;;  %s2540_s17 = sadd.s32 4294967294, %s2020_s26  }
 0x17c   : > { %s1344_s18 = sand.u32 1, %s2540_s17  }
 0x17d   : > { %s1345_s7 = scalar_lea.sflag [#allocation5], %s1344_s18 }
 0x17e   : > { %1991 = dma.done.wait (!%p1754_p3), %s1345_s7, 32  }
 0x17f   : > { %1993 = vsyncadd (!%p1754_p3), %s1345_s7, 4294967264  ;;  %s1361_s15 = scalar_lea.sflag [#allocation8], %s1335_s24 }
 0x180   : > { %1995 = dma.done.wait (!%p1754_p3), %s1361_s15, 16  }
 0x181   : > { %1997 = vsyncadd (!%p1754_p3), %s1361_s15, 4294967280  ;;  %s26_s26 = sadd.s32 1, %s2020_s26   ;;  %s2541_s21 = smov %s2004_s22 }
 0x182   : > { %p23_p4 = scmp.ge.s32.totalorder %s26_s26, 4   ;;  %s2542_s22 = smov %s2008_s23 }
 0x183   : > { %s2543_s23 = smov %s2121_s10  ;;  %s2544_s24 = smov %s2016_s25 }
 0x184   : > { %s2545_s25 = smov %s2547_s29  ;;  %25 = sbr.rel (!%p23_p4) target bundleno = 10 (0xa), region = 120 }
 0x18b   :  { %1365 = vsyncpa [#allocation3], 1 }
 0x18c   :  { %1367 = vsyncpa [#allocation3 + $0x1], 1 }
 0x18d   :  { %1368 = vsyncpa [#allocation5], 1 }
 0x18e   :  { %1370 = vsyncpa [#allocation5 + $0x1], 1 }
 0x18f   :  { %1371 = vsyncpa [#allocation8], 1 }
 0x190   :  { %1373 = vsyncpa [#allocation8 + $0x1], 1 }

</bundles_post_ra>
